<compile_context>
chip_gen: v6e
topology: v6e:2x2x1
jax: 0.10.0
libtpu: 0.0.40
codegen_flags: <defaults>
</compile_context>

<pallas_src>
import functools

import jax
import jax.numpy as jnp
from jax.experimental import pallas as pl
from jax.experimental.pallas import tpu as pltpu


def _round_up(n, m):
    return ((n + m - 1) // m) * m


def mlp_softmax_kernel(x_ref, w_ref, b_ref, o_ref, m_ref, s_ref, *,
                       in_p, hidden, batch, tile_b):
    """Grid = (phase, batch_tile); softmax over dim=0 done as a two-pass reduction."""
    p = pl.program_id(0)   # 0: accumulate softmax stats, 1: normalize & write
    b = pl.program_id(1)   # batch tile index

    # ---- logits for this batch tile (computed in both phases) ----------------
    x = x_ref[...].astype(jnp.bfloat16)                         # (tile_b, in_p)

    # Static, 16-row-aligned slices of the packed bf16 weights -> zero-cost views
    # (bf16 packs 16 sublanes per vreg; in_p, in_p+hidden, in_p+2*hidden are all
    #  multiples of 16).
    w1 = w_ref[0:in_p, :]                                # (in_p,   hidden); row in_dim = b1
    w2 = w_ref[in_p:in_p + hidden, :]                    # (hidden, hidden)
    w3 = w_ref[in_p + hidden:in_p + 2 * hidden, :]       # (hidden, hidden); cols >= out_dim are 0
    b2 = b_ref[1:2, :]                                   # (1, hidden) f32
    b3 = b_ref[2:3, :]                                   # (1, hidden) f32 (zero beyond out_dim)

    # fc_in + ReLU (b1 folded into w1 via x's constant 1.0 feature -> no bias add here)
    h = jnp.maximum(jnp.dot(x, w1, preferred_element_type=jnp.float32), 0.0)
    # fc_hidden + ReLU
    h2 = jnp.maximum(
        jnp.dot(h.astype(jnp.bfloat16), w2, preferred_element_type=jnp.float32) + b2, 0.0)
    # fc_out (lane-dense: all 128 columns; padded columns are zero and discarded later)
    logits = jnp.dot(h2.astype(jnp.bfloat16), w3, preferred_element_type=jnp.float32) + b3

    # Rows past the true batch size (batch padding up to tile_b) must not contribute
    # to the dim=0 softmax: push them to -1e30 so exp() underflows to 0.
    rows = jax.lax.broadcasted_iota(jnp.int32, (tile_b, hidden), 0) + b * tile_b
    logits = jnp.where(rows < batch, logits, -1e30)

    # ---- phase 0 / phase 1 machinery -----------------------------------------
    @pl.when(jnp.logical_and(p == 0, b == 0))
    def _init():
        m_ref[...] = jnp.full_like(m_ref, -jnp.inf)
        s_ref[...] = jnp.zeros_like(s_ref)
        o_ref[...] = jnp.zeros_like(o_ref)   # deterministic content for the dummy out block

    @pl.when(p == 0)
    def _accumulate():
        m_old = m_ref[...]
        m_new = jnp.maximum(m_old, jnp.max(logits, axis=0, keepdims=True))
        s_ref[...] = (s_ref[...] * jnp.exp(m_old - m_new)
                      + jnp.sum(jnp.exp(logits - m_new), axis=0, keepdims=True))
        m_ref[...] = m_new

    @pl.when(p == 1)
    def _normalize():
        # Exact reciprocal: the denominator is a single (1, hidden) vector, so the
        # cost is negligible and column sums stay at 1 to f32 precision.
        inv_s = pl.reciprocal(s_ref[...], approx=False)
        o_ref[...] = jnp.exp(logits - m_ref[...]) * inv_s


def pack_params(params, in_dim=8, out_dim=4, hidden_dim=128):
    """Pack the three (transposed) weights into one bf16 array with 16-row-aligned
    segments (b1 folded into the W1 block), and b2/b3 into one small f32 array."""
    assert hidden_dim % 128 == 0 and out_dim <= hidden_dim
    in_p = _round_up(in_dim + 1, 16)      # +1 = ones column for folded b1; 16 = bf16 sublane tile

    w1_blk = jnp.zeros((in_p, hidden_dim), jnp.float32)
    w1_blk = w1_blk.at[:in_dim, :].set(params["w1t"])
    w1_blk = w1_blk.at[in_dim, :].set(params["b1"])               # folded bias row
    w3_blk = jnp.zeros((hidden_dim, hidden_dim), jnp.float32)
    w3_blk = w3_blk.at[:, :out_dim].set(params["w3t"])

    w_pack = jnp.concatenate([w1_blk, params["w2t"], w3_blk], axis=0).astype(jnp.bfloat16)

    b_pack = jnp.zeros((8, hidden_dim), jnp.float32)
    b_pack = b_pack.at[1, :].set(params["b2"])
    b_pack = b_pack.at[2, :out_dim].set(params["b3"])

    return {"w": w_pack, "b": b_pack, "dims": (in_dim, out_dim, hidden_dim, in_p)}


def neural_network_forward(x, packed, *, tile_b=None):
    """x: (B, in_dim) float32; packed: output of pack_params(). Returns (B, out_dim)."""
    in_dim, out_dim, hidden, in_p = packed["dims"]
    B = x.shape[0]

    # Batch tile: 256 fills the 256-wide MXUs on v6e/v7x (128 already saturates v5e);
    # tiny batches just round up to the 8-sublane minimum.
    if tile_b is None:
        tile_b = max(8, min(256, _round_up(B, 8)))
    num_tiles = (B + tile_b - 1) // tile_b
    b_pad = num_tiles * tile_b

    # Pad features to in_p and set the constant 1.0 column that picks up the folded b1.
    x_aug = jnp.zeros((b_pad, in_p), jnp.float32)
    x_aug = x_aug.at[:B, :in_dim].set(x.astype(jnp.float32))
    x_aug = x_aug.at[:, in_dim].set(1.0)

    grid = (2, num_tiles)                          # (phase, batch tile)
    out_rows = (num_tiles + 1) * tile_b            # + one dummy block used during phase 0

    kernel = functools.partial(mlp_softmax_kernel, in_p=in_p, hidden=hidden,
                               batch=B, tile_b=tile_b)

    cost = pl.CostEstimate(
        flops=int(2 * num_tiles * 2 * tile_b * (in_p * hidden + 2 * hidden * hidden)),
        transcendentals=int(3 * num_tiles * tile_b * hidden),
        bytes_accessed=int(2 * x_aug.size * 4 + packed["w"].size * 2
                           + packed["b"].size * 4 + out_rows * hidden * 4),
    )

    out_pad = pl.pallas_call(
        kernel,
        out_shape=jax.ShapeDtypeStruct((out_rows, hidden), jnp.float32),
        grid_spec=pltpu.PrefetchScalarGridSpec(
            num_scalar_prefetch=0,
            grid=grid,
            in_specs=[
                pl.BlockSpec((tile_b, in_p), lambda p, b: (b, 0)),               # x tile
                pl.BlockSpec((in_p + 2 * hidden, hidden), lambda p, b: (0, 0)),  # weights (resident)
                pl.BlockSpec((8, hidden), lambda p, b: (0, 0)),                  # biases  (resident)
            ],
            # Phase 0 -> dummy trailing block; phase 1 -> block b. No block is written twice.
            out_specs=pl.BlockSpec((tile_b, hidden),
                                   lambda p, b: ((1 - p) * num_tiles + p * b, 0)),
            scratch_shapes=[
                pltpu.VMEM((1, hidden), jnp.float32),   # running column max (softmax over dim=0)
                pltpu.VMEM((1, hidden), jnp.float32),   # running column sum of exp
            ],
        ),
        # Phase axis is ordered; batch axis carries the softmax accumulators -> both arbitrary.
        compiler_params=pltpu.CompilerParams(
            dimension_semantics=("arbitrary", "arbitrary")),
        cost_estimate=cost,
    )(x_aug, packed["w"], packed["b"])

    return out_pad[:B, :out_dim]


def init_params(key, in_dim=8, out_dim=4, hidden_dim=128):
    """Xavier-normal weights, zero biases (matches NeuralNetwork.init_weights)."""
    k1, k2, k3 = jax.random.split(key, 3)

    def xavier_normal_t(k, fan_out, fan_in):
        std = (2.0 / (fan_in + fan_out)) ** 0.5
        # PyTorch weight shape is (out, in); we store the transpose (in, out).
        w = std * jax.random.normal(k, (fan_out, fan_in), dtype=jnp.float32)
        return w.T

    return {
        "w1t": xavier_normal_t(k1, hidden_dim, in_dim),      # (in_dim, hidden)
        "b1": jnp.zeros((hidden_dim,), jnp.float32),
        "w2t": xavier_normal_t(k2, hidden_dim, hidden_dim),  # (hidden, hidden)
        "b2": jnp.zeros((hidden_dim,), jnp.float32),
        "w3t": xavier_normal_t(k3, out_dim, hidden_dim),     # (hidden, out_dim)
        "b3": jnp.zeros((out_dim,), jnp.float32),
    }


def reference_forward(x, params):
    h = jax.nn.relu(x @ params["w1t"] + params["b1"])
    h2 = jax.nn.relu(h @ params["w2t"] + params["b2"])
    logits = h2 @ params["w3t"] + params["b3"]
    return jax.nn.softmax(logits, axis=0)


if __name__ == "__main__":
    key = jax.random.PRNGKey(0)
    k_param, k_x = jax.random.split(key)

    in_dim, out_dim, hidden_dim = 8, 4, 128
    batch = 20       # not a multiple of the tile -> exercises padded-row masking
    tile_b = 8       # 3 batch tiles -> exercises the cross-tile two-pass softmax

    params = init_params(k_param, in_dim, out_dim, hidden_dim)
    packed = pack_params(params, in_dim, out_dim, hidden_dim)
    x = jax.random.normal(k_x, (batch, in_dim), dtype=jnp.float32)

    out = neural_network_forward(x, packed, tile_b=tile_b)
    out = jax.block_until_ready(out)

    assert out.shape == (batch, out_dim)
    # softmax over dim=0 => each output column sums to ~1 (exact reciprocal now)
    col_sums = jnp.sum(out, axis=0)
    assert bool(jnp.all(jnp.abs(col_sums - 1.0) < 1e-3)), col_sums
    # loose check vs f32 reference (bf16 MXU inputs introduce small differences)
    ref = reference_forward(x, params)
    assert bool(jnp.all(jnp.abs(out - ref) < 0.05)), jnp.max(jnp.abs(out - ref))

    print("KERNEL_OK")
</pallas_src>

<mosaic_0001>
module attributes {stable_mosaic.version = 11 : i64} {
  func.func @mlp_softmax_kernel(%arg0: i32, %arg1: i32, %arg2: memref<8x16xf32, #tpu.memory_space<vmem>>, %arg3: memref<272x128xbf16, #tpu.memory_space<vmem>>, %arg4: memref<8x128xf32, #tpu.memory_space<vmem>>, %arg5: memref<8x128xf32, #tpu.memory_space<vmem>>, %arg6: memref<1x128xf32, #tpu.memory_space<vmem>>, %arg7: memref<1x128xf32, #tpu.memory_space<vmem>>) attributes {dimension_semantics = [#tpu.dimension_semantics<arbitrary>, #tpu.dimension_semantics<arbitrary>], iteration_bounds = array<i64: 2, 3>, scalar_prefetch = 0 : i64, scratch_operands = 2 : i64, tpu.core_type = #tpu.core_type<tc>, window_params = [{transform_indices = @transform_0, window_bounds = array<i64: 8, 16>}, {pipeline_mode = #tpu.pipeline_mode<synchronous>, transform_indices = @transform_1, window_bounds = array<i64: 272, 128>}, {pipeline_mode = #tpu.pipeline_mode<synchronous>, transform_indices = @transform_2, window_bounds = array<i64: 8, 128>}, {transform_indices = @transform_3, window_bounds = array<i64: 8, 128>}]} {
    %c0 = arith.constant 0 : index
    %c0_0 = arith.constant 0 : index
    %0 = vector.load %arg2[%c0, %c0_0] : memref<8x16xf32, #tpu.memory_space<vmem>>, vector<8x16xf32>
    %1 = arith.truncf %0 : vector<8x16xf32> to vector<8x16xbf16>
    %c0_1 = arith.constant 0 : index
    %c0_2 = arith.constant 0 : index
    %2 = vector.load %arg3[%c0_1, %c0_2] : memref<272x128xbf16, #tpu.memory_space<vmem>>, vector<16x128xbf16>
    %c16 = arith.constant 16 : index
    %c0_3 = arith.constant 0 : index
    %3 = vector.load %arg3[%c16, %c0_3] : memref<272x128xbf16, #tpu.memory_space<vmem>>, vector<128x128xbf16>
    %c144 = arith.constant 144 : index
    %c0_4 = arith.constant 0 : index
    %4 = vector.load %arg3[%c144, %c0_4] : memref<272x128xbf16, #tpu.memory_space<vmem>>, vector<128x128xbf16>
    %c1 = arith.constant 1 : index
    %c0_5 = arith.constant 0 : index
    %5 = vector.load %arg4[%c1, %c0_5] : memref<8x128xf32, #tpu.memory_space<vmem>>, vector<1x128xf32>
    %c2 = arith.constant 2 : index
    %c0_6 = arith.constant 0 : index
    %6 = vector.load %arg4[%c2, %c0_6] : memref<8x128xf32, #tpu.memory_space<vmem>>, vector<1x128xf32>
    %cst = arith.constant dense<0.000000e+00> : vector<8x128xf32>
    %7 = tpu.matmul %1, %2, %cst {dimension_numbers = #tpu.dot_dimension_numbers<[1], [0], [0], [1], [0, 0, 1, 1], [], []>} : vector<8x16xbf16>, vector<16x128xbf16>, vector<8x128xf32> -> vector<8x128xf32>
    %cst_7 = arith.constant 0.000000e+00 : f32
    %8 = vector.broadcast %cst_7 : f32 to vector<8x128xf32>
    %9 = arith.maximumf %7, %8 : vector<8x128xf32>
    %10 = arith.truncf %9 : vector<8x128xf32> to vector<8x128xbf16>
    %cst_8 = arith.constant dense<0.000000e+00> : vector<8x128xf32>
    %11 = tpu.matmul %10, %3, %cst_8 {dimension_numbers = #tpu.dot_dimension_numbers<[1], [0], [0], [1], [0, 0, 1, 1], [], []>} : vector<8x128xbf16>, vector<128x128xbf16>, vector<8x128xf32> -> vector<8x128xf32>
    %12 = vector.broadcast %5 : vector<1x128xf32> to vector<8x128xf32>
    %13 = arith.addf %11, %12 : vector<8x128xf32>
    %cst_9 = arith.constant 0.000000e+00 : f32
    %14 = vector.broadcast %cst_9 : f32 to vector<8x128xf32>
    %15 = arith.maximumf %13, %14 : vector<8x128xf32>
    %16 = arith.truncf %15 : vector<8x128xf32> to vector<8x128xbf16>
    %cst_10 = arith.constant dense<0.000000e+00> : vector<8x128xf32>
    %17 = tpu.matmul %16, %4, %cst_10 {dimension_numbers = #tpu.dot_dimension_numbers<[1], [0], [0], [1], [0, 0, 1, 1], [], []>} : vector<8x128xbf16>, vector<128x128xbf16>, vector<8x128xf32> -> vector<8x128xf32>
    %18 = vector.broadcast %6 : vector<1x128xf32> to vector<8x128xf32>
    %19 = arith.addf %17, %18 : vector<8x128xf32>
    %20 = tpu.iota {dimensions = array<i32: 0>} : vector<8x128xi32>
    %c8_i32 = arith.constant 8 : i32
    %21 = arith.muli %arg1, %c8_i32 : i32
    %22 = vector.broadcast %21 : i32 to vector<8x128xi32>
    %23 = arith.addi %20, %22 : vector<8x128xi32>
    %c20_i32 = arith.constant 20 : i32
    %24 = vector.broadcast %c20_i32 : i32 to vector<8x128xi32>
    %25 = arith.cmpi slt, %23, %24 : vector<8x128xi32>
    %cst_11 = arith.constant -1.000000e+30 : f32
    %26 = vector.broadcast %cst_11 : f32 to vector<8x128xf32>
    %27 = arith.select %25, %19, %26 : vector<8x128xi1>, vector<8x128xf32>
    %c0_i32 = arith.constant 0 : i32
    %28 = arith.cmpi eq, %arg0, %c0_i32 : i32
    %c0_i32_12 = arith.constant 0 : i32
    %29 = arith.cmpi eq, %arg1, %c0_i32_12 : i32
    %30 = arith.andi %28, %29 : i1
    %31 = arith.extui %30 : i1 to i32
    %c0_i32_13 = arith.constant 0 : i32
    %32 = arith.cmpi ne, %31, %c0_i32_13 : i32
    scf.if %32 {
      %cst_17 = arith.constant 0xFF800000 : f32
      %39 = vector.broadcast %cst_17 : f32 to vector<1x128xf32>
      %c0_18 = arith.constant 0 : index
      %c0_19 = arith.constant 0 : index
      %40 = vector.load %arg6[%c0_18, %c0_19] : memref<1x128xf32, #tpu.memory_space<vmem>>, vector<1x128xf32>
      tpu.vector_store %arg6[%c0_18, %c0_19], %39 {strides = array<i32>} : memref<1x128xf32, #tpu.memory_space<vmem>>, vector<1x128xf32>,
      %cst_20 = arith.constant 0.000000e+00 : f32
      %41 = vector.broadcast %cst_20 : f32 to vector<1x128xf32>
      %c0_21 = arith.constant 0 : index
      %c0_22 = arith.constant 0 : index
      %42 = vector.load %arg7[%c0_21, %c0_22] : memref<1x128xf32, #tpu.memory_space<vmem>>, vector<1x128xf32>
      tpu.vector_store %arg7[%c0_21, %c0_22], %41 {strides = array<i32>} : memref<1x128xf32, #tpu.memory_space<vmem>>, vector<1x128xf32>,
      %cst_23 = arith.constant 0.000000e+00 : f32
      %43 = vector.broadcast %cst_23 : f32 to vector<8x128xf32>
      %c0_24 = arith.constant 0 : index
      %c0_25 = arith.constant 0 : index
      %44 = vector.load %arg5[%c0_24, %c0_25] : memref<8x128xf32, #tpu.memory_space<vmem>>, vector<8x128xf32>
      tpu.vector_store %arg5[%c0_24, %c0_25], %43 {strides = array<i32>} : memref<8x128xf32, #tpu.memory_space<vmem>>, vector<8x128xf32>,
    } else {
    }
    %c0_i32_14 = arith.constant 0 : i32
    %33 = arith.cmpi eq, %arg0, %c0_i32_14 : i32
    %34 = arith.extui %33 : i1 to i32
    %c0_i32_15 = arith.constant 0 : i32
    %35 = arith.cmpi ne, %34, %c0_i32_15 : i32
    scf.if %35 {
      %c0_17 = arith.constant 0 : index
      %c0_18 = arith.constant 0 : index
      %39 = vector.load %arg6[%c0_17, %c0_18] : memref<1x128xf32, #tpu.memory_space<vmem>>, vector<1x128xf32>
      %cst_19 = arith.constant dense<0xFF800000> : vector<128xf32>
      %40 = vector.multi_reduction <maximumf>, %27, %cst_19 [0] : vector<8x128xf32> to vector<128xf32>
      %41 = vector.shape_cast %40 : vector<128xf32> to vector<1x128xf32>
      %42 = arith.maximumf %39, %41 : vector<1x128xf32>
      %c0_20 = arith.constant 0 : index
      %c0_21 = arith.constant 0 : index
      %43 = vector.load %arg7[%c0_20, %c0_21] : memref<1x128xf32, #tpu.memory_space<vmem>>, vector<1x128xf32>
      %44 = arith.subf %39, %42 : vector<1x128xf32>
      %45 = math.exp %44 : vector<1x128xf32>
      %46 = arith.mulf %43, %45 : vector<1x128xf32>
      %47 = vector.broadcast %42 : vector<1x128xf32> to vector<8x128xf32>
      %48 = arith.subf %27, %47 : vector<8x128xf32>
      %49 = math.exp %48 : vector<8x128xf32>
      %cst_22 = arith.constant dense<0.000000e+00> : vector<128xf32>
      %50 = vector.multi_reduction <add>, %49, %cst_22 [0] : vector<8x128xf32> to vector<128xf32>
      %51 = vector.shape_cast %50 : vector<128xf32> to vector<1x128xf32>
      %52 = arith.addf %46, %51 : vector<1x128xf32>
      %c0_23 = arith.constant 0 : index
      %c0_24 = arith.constant 0 : index
      %53 = vector.load %arg7[%c0_23, %c0_24] : memref<1x128xf32, #tpu.memory_space<vmem>>, vector<1x128xf32>
      tpu.vector_store %arg7[%c0_23, %c0_24], %52 {strides = array<i32>} : memref<1x128xf32, #tpu.memory_space<vmem>>, vector<1x128xf32>,
      %c0_25 = arith.constant 0 : index
      %c0_26 = arith.constant 0 : index
      %54 = vector.load %arg6[%c0_25, %c0_26] : memref<1x128xf32, #tpu.memory_space<vmem>>, vector<1x128xf32>
      tpu.vector_store %arg6[%c0_25, %c0_26], %42 {strides = array<i32>} : memref<1x128xf32, #tpu.memory_space<vmem>>, vector<1x128xf32>,
    } else {
    }
    %c1_i32 = arith.constant 1 : i32
    %36 = arith.cmpi eq, %arg0, %c1_i32 : i32
    %37 = arith.extui %36 : i1 to i32
    %c0_i32_16 = arith.constant 0 : i32
    %38 = arith.cmpi ne, %37, %c0_i32_16 : i32
    scf.if %38 {
      %c0_17 = arith.constant 0 : index
      %c0_18 = arith.constant 0 : index
      %39 = vector.load %arg7[%c0_17, %c0_18] : memref<1x128xf32, #tpu.memory_space<vmem>>, vector<1x128xf32>
      %40 = tpu.reciprocal %39 : vector<1x128xf32> -> vector<1x128xf32>
      %c0_19 = arith.constant 0 : index
      %c0_20 = arith.constant 0 : index
      %41 = vector.load %arg6[%c0_19, %c0_20] : memref<1x128xf32, #tpu.memory_space<vmem>>, vector<1x128xf32>
      %42 = vector.broadcast %41 : vector<1x128xf32> to vector<8x128xf32>
      %43 = arith.subf %27, %42 : vector<8x128xf32>
      %44 = math.exp %43 : vector<8x128xf32>
      %45 = vector.broadcast %40 : vector<1x128xf32> to vector<8x128xf32>
      %46 = arith.mulf %44, %45 : vector<8x128xf32>
      %c0_21 = arith.constant 0 : index
      %c0_22 = arith.constant 0 : index
      %47 = vector.load %arg5[%c0_21, %c0_22] : memref<8x128xf32, #tpu.memory_space<vmem>>, vector<8x128xf32>
      tpu.vector_store %arg5[%c0_21, %c0_22], %46 {strides = array<i32>} : memref<8x128xf32, #tpu.memory_space<vmem>>, vector<8x128xf32>,
    } else {
    }
    return
  }
  func.func @transform_0(%arg0: i32, %arg1: i32) -> (i32, i32) {
    %c0_i32 = arith.constant 0 : i32
    %c0_i32_0 = arith.constant 0 : i32
    return %arg1, %c0_i32 : i32, i32
  }
  func.func @transform_1(%arg0: i32, %arg1: i32) -> (i32, i32) {
    %c0_i32 = arith.constant 0 : i32
    %c0_i32_0 = arith.constant 0 : i32
    %c0_i32_1 = arith.constant 0 : i32
    return %c0_i32, %c0_i32_0 : i32, i32
  }
  func.func @transform_2(%arg0: i32, %arg1: i32) -> (i32, i32) {
    %c0_i32 = arith.constant 0 : i32
    %c0_i32_0 = arith.constant 0 : i32
    %c0_i32_1 = arith.constant 0 : i32
    return %c0_i32, %c0_i32_0 : i32, i32
  }
  func.func @transform_3(%arg0: i32, %arg1: i32) -> (i32, i32) {
    %c1_i32 = arith.constant 1 : i32
    %0 = arith.subi %c1_i32, %arg0 : i32
    %c3_i32 = arith.constant 3 : i32
    %1 = arith.muli %0, %c3_i32 : i32
    %2 = arith.muli %arg0, %arg1 : i32
    %3 = arith.addi %1, %2 : i32
    %c0_i32 = arith.constant 0 : i32
    %c0_i32_0 = arith.constant 0 : i32
    return %3, %c0_i32 : i32, i32
  }
}

</mosaic_0001>

<bundles_post_ra>
// kernel: tpu_custom_call.1
= control target key start
LH: loop header
LB: loop body
LE: loop exit
PB: predicated region body
PF: predicated region fallthrough
CT: control target
= control target key end

     0   :  { %s1232_s0 = inlined_call_operand.vmem [shape: f32[24,16], index: 0, kind: input, shape index: {}]   ;;  %s1233_s1 = inlined_call_operand.hbm [shape: bf16[272,128], index: 1, kind: input, shape index: {}]   ;;  %s1234_s2 = inlined_call_operand.vmem [shape: f32[8,128], index: 2, kind: input, shape index: {}]   ;;  %s1235_s3 = inlined_call_operand.hbm [shape: f32[32,128], index: 3, kind: output, shape index: {}]  }
   0x1   :  { %1236 = sst [smem:[#allocation10_spill]] %s1232_s0 }
   0x2   :  { %8 = vsyncpa [#allocation5], 0 }
   0x3   :  { %9 = vsyncpa [#allocation6], 0 }
   0x4   :  { %11 = vsyncpa [#allocation6 + $0x1], 0  ;;  %s1026_s12 = smov 0   ;;  %s1028_s13 = smov 0  }
   0x5   :  { %s1030_s14 = smov 0   ;;  %s1032_s15 = smov 0  }
   0x6   :  { %s1034_s16 = smov 0   ;;  %s1036_s17 = smov 0  }
   0x7   :  { %s1038_s18 = smov 0   ;;  %s1040_s19 = smov 0  }
   0x8 LB: > { %s658_s20 = sadd.s32 4294967295, %s996_s19   ;;  %s659_s21 = sadd.s32 4294967294, %s996_s19   ;;  %s996_s19 = sphi %s1040_s19, %s17_s19   ;;  %s992_s18 = sphi %s1038_s18, %s1250_s18   ;;  %s988_s17 = sphi %s1036_s17, %s1249_s17   ;;  %s984_s16 = sphi %s1034_s16, %s1248_s16   ;;  %s980_s15 = sphi %s1032_s15, %s1247_s15   ;;  %s976_s14 = sphi %s1030_s14, %s1246_s14   ;;  %s972_s13 = sphi %s1028_s13, %s1245_s13   ;;  %s968_s12 = sphi %s1026_s12, %s1244_s12  }
   0x9   : > { %s26_s22 = sadd.s32 1, %s988_s17  ;;  %s29_s23 = sadd.s32 1, %s992_s18 }
   0xa   : > { %p27_p0 = scmp.ge.s32.totalorder %s26_s22, 3  ;;  %s101_s24 = ssub.s32 1, %s992_s18 }
   0xb   : > { %s102_s25 = smul.u32 3, %s101_s24  ;;  %s112_s26 = sadd.s32 1, %s976_s14 }
   0xc   : > { %s1252_s22 = smov (%p27_p0, %s26_s22), 0  ;;  %s1254_s23 = smov (!%p27_p0, %s29_s23), %s992_s18 }
   0xd   : > { %s103_s27 = smul.u32 %s988_s17, %s992_s18  ;;  %p122_p1 = scmp.ne.s32.totalorder %s976_s14, %s972_s13 }
   0xe   : > { %p31_p2 = scmp.ge.s32.totalorder %s1254_s23, 2  ;;  %p123_p3 = scmp.eq.s32.totalorder %s658_s20, 5 }
   0xf   : > { %s104_s28 = sadd.s32 %s103_s27, %s102_s25  ;;  %p128_p4 = scmp.ne.s32.totalorder %s972_s13, %s968_s12 }
  0x10   : > { %s1256_s23 = smov (%p31_p2, %s1254_s23), 0  ;;  %p1083_p5 = por %p123_p3, %p122_p1 }
  0x11   : > { %p129_p6 = scmp.eq.s32.totalorder %s659_s21, 5  ;;  %s105_s30 = ssub.s32 1, %s1256_s23 }
  0x12   : > { %s107_s4 = smul.u32 %s1256_s23, %s1252_s22  ;;  %p660_p8 = scmp.ge.s32.totalorder %s996_s19, 1 }
  0x13   : > { %s106_s5 = smul.u32 3, %s105_s30  ;;  %p1090_p7 = por %p129_p6, %p128_p4 }
  0x14   : > { %p136_p9 = scmp.lt.s32.totalorder %s996_s19, 7  ;;  %p1100_p12 = scmp.eq.s32.totalorder %s658_s20, 0 }
  0x15   : > { %s108_s7 = sadd.s32 %s107_s4, %s106_s5  ;;  %s998_s21 = smov [#allocation4]  }
  0x16   : > { %s109_s8 = ssub.s32 %s104_s28, %s108_s7  ;;  %p1096_p10 = pnand %p660_p8, %p136_p9 }
  0x17   : > { %p110_p11 = scmp.eq.s32.totalorder %s109_s8, 0  ;;  %s148_s24 = sshll.u32 %s998_s21, 4  ;;  %s149_s24 = int_to_ptr.vmem [resolvable:$true] %s148_s24 }
  0x18   : > { %p767_p13 = pneg %p1096_p10  ;;  %s885_s20 = scalar_lea.vmem %s149_s24, 2176 }
  0x19   : > { %s1107_s11 = scalar_select %p110_p11, %s976_s14, %s112_s26  }
  0x1a   : > { %p1111_p0 = pnand %p1100_p12, %p767_p13  ;;  %p886_p2 = scmp.ne.s32.totalorder %s149_s24, %s885_s20 }
  0x1b   : > { %p893_p6 = scmp.lt.s32.totalorder %s149_s24, %s149_s24  ;;  %p894_p8 = scmp.lt.s32.totalorder %s885_s20, %s885_s20 }
  0x1c   : > { %p876_p1 = pneg %p1111_p0 }
  0x1d   : > { %p895_p9 = por %p894_p8, %p893_p6 }
  0x1e   : > { %p888_p3 = pnand %p886_p2, %p876_p1 }
  0x20   : > { %p889_p4 = pneg %p888_p3 }
  0x22   : > { %p896_p11 = pnand %p895_p9, %p889_p4 }
  0x24   : > { %899 = shalt.err (!%p896_p11)
}
  0x25   : > { %s999_s26 = smov 64   ;;  %s1000_s27 = smov 4  }
  0x26   : > { %770 = dma.hbm_to_vmem [thread:$0]  (!%p1111_p0), %s1233_s1, 2176, %s149_s24, [#allocation5], %s999_s26, %s999_s26, %s1000_s27  }
  0x27   : > { %174 = sbr.rel (%p1096_p10) target bundleno = 765 (0x2fd), region = 32 }
  0x2c   : > { %959 = dma.done.wait (%p1100_p12), [#allocation5], 2176  }
  0x2d   : > { %961 = vsyncadd (%p1100_p12), [#allocation5], 4294965120  ;;  %s194_s4 = sand.u32 1, %s972_s13   ;;  %p197_p13 = scmp.lt.s32.totalorder %s980_s15, 2  ;;  %v1001_v0 = vmov 0.0   ;;  %vm1002_vm0 = vmmov 0   ;;  %v482_v34 = vlaneseq }
  0x2e   : > { %s1132_s5 = sshll.u32 %s194_s4, 3  ;;  %715 = vmatprep.subr.bf16.mxu0 %v1001_v0  ;;  %717 = vmatprep.mubr.msk.bf16.mxu0 %vm1002_vm0, %v1001_v0  ;;  %s1242_s0 = sld [smem:[#allocation10_spill]]  ;;  %v849_v1 = vld [vmem:[#allocation4] sm:$0xff]   ;;  %vm250_vm1 = vcmask 130048   ;;  %v851_v5 = vld [vmem:[#allocation4 + $0x38] sm:$0xff]   ;;  %v852_v6 = vld [vmem:[#allocation4 + $0x30] sm:$0xff]  }
  0x2f   : > { %721 = vmatprep.subr.bf16.mxu1 %v1001_v0  ;;  %737 = vmatprep.mubr.msk.bf16.mxu1 %vm1002_vm0, %v1001_v0  ;;  %s198_s7 = scalar_select %p197_p13, %s980_s15, 2  ;;  %v850_v4 = vld [vmem:[#allocation4 + $0x40] sm:$0xff]   ;;  %v853_v7 = vld [vmem:[#allocation4 + $0x28] sm:$0xff]   ;;  %v855_v9 = vld [vmem:[#allocation4 + $0x18] sm:$0xff]   ;;  %v483_v35 = vshrl.u32 %v482_v34, 7 }
  0x30   : > { %716 = vmatpush3.bf16.msra.mxu0 %v849_v1  ;;  %722 = vmatpush3.bf16.msra.mxu1 %v850_v4  ;;  %v854_v8 = vld [vmem:[#allocation4 + $0x20] sm:$0xff]   ;;  %v856_v10 = vld [vmem:[#allocation4 + $0x10] sm:$0xff]   ;;  %v857_v11 = vld [vmem:[#allocation4 + $0x8] sm:$0xff]   ;;  %p489_p10 = scmp.eq.s32.totalorder %s984_s16, 0  ;;  %p490_p12 = scmp.eq.s32.totalorder %s980_s15, 0 }
  0x31   : > { %s666_s8 = sshll.u32 %s198_s7, 3  ;;  %741 = vmatprep.subr.bf16.mxu0 %v1001_v0  ;;  %723 = vmatprep.subr.bf16.mxu1 %v1001_v0  ;;  %v858_v12 = vld [vmem:[#allocation4 + $0x80] sm:$0xff]   ;;  %v859_v13 = vld [vmem:[#allocation4 + $0x78] sm:$0xff]   ;;  %v860_v14 = vld [vmem:[#allocation4 + $0x70] sm:$0xff]   ;;  %s687_s26 = sshll.u32 %s980_s15, 3 }
  0x32   : > { %v861_v15 = vld [vmem:[#allocation4 + $0x68] sm:$0xff]   ;;  %v862_v16 = vld [vmem:[#allocation4 + $0x60] sm:$0xff]   ;;  %v863_v17 = vld [vmem:[#allocation4 + $0x58] sm:$0xff]   ;;  %p1166_p0 = pnand %p490_p12, %p489_p10  ;;  %v485_v36 = vstv %s687_s26  ;;  %s1175_s30 = scalar_lea.vmem [#allocation7], %s1132_s5 }
  0x33   : > { %v864_v24 = vld [vmem:[#allocation4 + $0x50] sm:$0xff]   ;;  %v865_v25 = vld [vmem:[#allocation4 + $0x48] sm:$0xff]   ;;  %v669_v26 = vld [vmem:[%s1234_s2 + $0x1] ss:$0 sm:$0xff]  ;;  %v486_v37 = vadd.s32 %v485_v36, %v483_v35 }
  0x34   : > { %s200_s21 = scalar_lea.vmem %s1242_s0, %s666_s8  ;;  %724 = vmatpush3.bf16.msra.mxu1 %v851_v5  ;;  %v678_v38 = vld [vmem:[%s1234_s2 + $0x2] ss:$0 sm:$0xff] }
  0x35   : > { %v206_v2 = vld [vmem:[%s200_s21] sm:$0xff]  ;;  %725 = vmatprep.subr.bf16.mxu1 %v1001_v0  ;;  %vm487_vm2 = vcmp.lt.s32.totalorder %v486_v37, 20 }
  0x36   : > { %v207_v3 = vpack.c.bf16 %v206_v2, %v206_v2 }
  0x38   : > { %718 = vmatmul.mubr.msk.bf16.vlgmr.msra.gmra.mxu0 %vm250_vm1, %v207_v3  ;;  %726 = vmatpush3.bf16.msra.mxu1 %v852_v6 }
  0x39   : > { %757 = vmatprep.mubr.msk.bf16.mxu0 %vm1002_vm0, %v1001_v0  ;;  %727 = vmatprep.subr.bf16.mxu1 %v1001_v0 }
  0x3a   : > { %742 = vmatpush3.bf16.msra.mxu0 %v858_v12 }
  0x3b   : > { %743 = vmatprep.subr.bf16.mxu0 %v1001_v0 }
  0x3c   : > { %728 = vmatpush3.bf16.msra.mxu1 %v853_v7 }
  0x3d   : > { %729 = vmatprep.subr.bf16.mxu1 %v1001_v0 }
  0x3e   : > { %744 = vmatpush3.bf16.msra.mxu0 %v859_v13 }
  0x3f   : > { %745 = vmatprep.subr.bf16.mxu0 %v1001_v0 }
  0x40   : > { %730 = vmatpush3.bf16.msra.mxu1 %v854_v8 }
  0x41   : > { %731 = vmatprep.subr.bf16.mxu1 %v1001_v0 }
  0x42   : > { %746 = vmatpush3.bf16.msra.mxu0 %v860_v14 }
  0x43   : > { %747 = vmatprep.subr.bf16.mxu0 %v1001_v0 }
  0x44   : > { %732 = vmatpush3.bf16.msra.mxu1 %v855_v9 }
  0x45   : > { %733 = vmatprep.subr.bf16.mxu1 %v1001_v0 }
  0x46   : > { %748 = vmatpush3.bf16.msra.mxu0 %v861_v15 }
  0x47   : > { %749 = vmatprep.subr.bf16.mxu0 %v1001_v0 }
  0x48   : > { %734 = vmatpush3.bf16.msra.mxu1 %v856_v10 }
  0x49   : > { %735 = vmatprep.subr.bf16.mxu1 %v1001_v0 }
  0x4a   : > { %750 = vmatpush3.bf16.msra.mxu0 %v862_v16 }
  0x4b   : > { %751 = vmatprep.subr.bf16.mxu0 %v1001_v0 }
  0x4c   : > { %736 = vmatpush3.bf16.msra.mxu1 %v857_v11 }
  0x4e   : > { %752 = vmatpush3.bf16.msra.mxu0 %v863_v17 }
  0x4f   : > { %753 = vmatprep.subr.bf16.mxu0 %v1001_v0 }
  0x52   : > { %754 = vmatpush3.bf16.msra.mxu0 %v864_v24 }
  0x53   : > { %755 = vmatprep.subr.bf16.mxu0 %v1001_v0 }
  0x56   : > { %756 = vmatpush3.bf16.msra.mxu0 %v865_v25 }
  0xf8   : > { %v288_v18 = vpop.f32.mrf.mxu0 }
  0xf9   : > { %v294_v19 = vmax.f32 %v288_v18, 0.0 }
  0xfa   : > { %v719_v20 = vpop.f32.mrf.mxu0 }
  0xfb   : > { %v295_v21 = vpack.c.bf16 %v294_v19, %v294_v19 }
  0xfc   : > { %v291_v22 = vpop.f32.mrf.mxu0 }
  0xfd   : > { %738 = vmatmul.mubr.bf16.vlgmr.msra.gmra.mxu1 %v295_v21 }
  0xfe   : > { %v720_v23 = vpop.f32.mrf.mxu0 }
 0x1bd   : > { %v382_v27 = vpop.f32.mrf.mxu1 }
 0x1be   : > { %v383_v28 = vadd.f32 %v669_v26, %v382_v27 }
 0x1bf   : > { %v739_v29 = vpop.f32.mrf.mxu1 }
 0x1c0   : > { %v388_v30 = vmax.f32 %v383_v28, 0.0 }
 0x1c1   : > { %v385_v31 = vpop.f32.mrf.mxu1 }
 0x1c2   : > { %v389_v32 = vpack.c.bf16 %v388_v30, %v388_v30 }
 0x1c3   : > { %v740_v33 = vpop.f32.mrf.mxu1 }
 0x1c4   : > { %758 = vmatmul.mubr.bf16.vlgmr.msra.gmra.mxu0 %v389_v32 }
 0x284   : > { %v476_v39 = vpop.f32.mrf.mxu0 }
 0x285   : > { %v477_v40 = vadd.f32 %v678_v38, %v476_v39 }
 0x286   : > { %v759_v41 = vpop.f32.mrf.mxu0  ;;  %494 = sbr.rel (%p1166_p0) target bundleno = 654 (0x28e), region = 40 }
 0x287   : > { %v488_v42 = vsel %vm487_vm2, %v477_v40, -1e+30 }
 0x288   : > { %v479_v43 = vpop.f32.mrf.mxu0 }
 0x28a   : > { %v760_v44 = vpop.f32.mrf.mxu0 }
 0x28b   : > { %v1003_v45 = vmov -inf   ;;  %v1004_v46 = vmov 0.0  }
 0x28c   : > { %495 = vst [vmem:[#allocation2] sm:$0x1] %v1003_v45  ;;  %496 = vst [vmem:[#allocation3] sm:$0x1] %v1004_v46 }
 0x28d   : > { %497 = vst [vmem:[%s1175_s30] sm:$0xff] %v1004_v46 }
 0x28e PF: > { %p688_p1 = scmp.ne.s32.totalorder %s984_s16, 0 }
 0x290   : > { %500 = sbr.rel (%p688_p1) target bundleno = 710 (0x2c6), region = 44 }
 0x295   : > { %v502_v47 = vrot.slane %v488_v42, 4  ;;  %v501_v52 = vld [vmem:[#allocation2] sm:$0x1]  ;;  %v517_v54 = vsub.s32 0, %v483_v35  ;;  %v509_v2 = vld [vmem:[#allocation3] sm:$0x1] }
 0x297   : > { %v503_v48 = vmax.f32 %v488_v42, %v502_v47 }
 0x299   : > { %v504_v49 = vrot.slane %v503_v48, 2 }
 0x29b   : > { %v505_v50 = vmax.f32 %v503_v48, %v504_v49 }
 0x29d   : > { %v506_v51 = vrot.slane %v505_v50, 1 }
 0x29f   : > { %v507_v53 = vmax.f32 %v505_v50, %v506_v51 }
 0x2a1   : > { %v508_v55 = vmax.f32 %v501_v52, %v507_v53 }
 0x2a3   : > { %v518_v56 = vrot.slane %v508_v55, %v517_v54  ;;  %531 = vst [vmem:[#allocation2] sm:$0x1] %v508_v55  ;;  %v510_v58 = vsub.f32 %v501_v52, %v508_v55 }
 0x2a5   : > { %v520_v57 = vsub.f32 %v488_v42, %v518_v56  ;;  %v511_v60 = vmul.f32 1.442695, %v510_v58 }
 0x2a7   : > { %v521_v59 = vmul.f32 1.442695, %v520_v57 }
 0x2a9   : > { %866 = vpow2.f32 %v521_v59 }
 0x2aa   : > { %868 = vpow2.f32 %v511_v60 }
 0x2b6   : > { %v867_v61 = vpop.eup %866 }
 0x2b7   : > { %v523_v62 = vrot.slane %v867_v61, 4  ;;  %v869_v1 = vpop.eup %868 }
 0x2b8   : > { %v513_v4 = vmul.f32 %v869_v1, %v509_v2 }
 0x2b9   : > { %v524_v63 = vadd.f32 %v867_v61, %v523_v62 }
 0x2bb   : > { %v525_v0 = vrot.slane %v524_v63, 2 }
 0x2bd   : > { %v526_v3 = vadd.f32 %v525_v0, %v524_v63 }
 0x2bf   : > { %v527_v5 = vrot.slane %v526_v3, 1 }
 0x2c1   : > { %v528_v6 = vadd.f32 %v527_v5, %v526_v3 }
 0x2c3   : > { %v529_v7 = vadd.f32 %v528_v6, %v513_v4 }
 0x2c5   : > { %530 = vst [vmem:[#allocation3] sm:$0x1] %v529_v7 }
 0x2c6 PF: > { %p689_p2 = scmp.ne.s32.totalorder %s984_s16, 1 }
 0x2c8   : > { %535 = sbr.rel (%p689_p2) target bundleno = 739 (0x2e3), region = 48 }
 0x2cd   : > { %v536_v8 = vld [vmem:[#allocation3] sm:$0x1]  ;;  %v690_v9 = vld [vmem:[#allocation2] ss:$0 sm:$0xff]  ;;  %v551_v12 = vsub.s32 0, %v483_v35 }
 0x2ce   : > { %870 = vrcp.f32 %v536_v8  ;;  %v545_v10 = vsub.f32 %v488_v42, %v690_v9 }
 0x2d0   : > { %v546_v11 = vmul.f32 1.442695, %v545_v10 }
 0x2d2   : > { %872 = vpow2.f32 %v546_v11 }
 0x2db   : > { %v871_v13 = vpop.eup %870 }
 0x2dc   : > { %v552_v14 = vrot.slane %v871_v13, %v551_v12 }
 0x2df   : > { %v873_v15 = vpop.eup %872 }
 0x2e0   : > { %v554_v16 = vmul.f32 %v873_v15, %v552_v14 }
 0x2e2   : > { %555 = vst [vmem:[%s1175_s30] sm:$0xff] %v554_v16 }
 0x2e3 PF: > { %s564_s5 = ssub.s32 1, %s984_s16  ;;  %s574_s8 = sshll.u32 %s1175_s30, 4  ;;  %s575_s8 = int_to_ptr.vmem [resolvable:$true] %s574_s8 }
 0x2e4   : > { %s565_s7 = smul.u32 3, %s564_s5  ;;  %s557_s26 = scalar_lea.sflag [#allocation6], %s194_s4 }
 0x2e5   : > { %s566_s9 = smul.u32 %s980_s15, %s984_s16  ;;  %s900_s27 = scalar_lea.vmem %s575_s8, 128 }
 0x2e6   : > { %p901_p3 = scmp.ne.s32.totalorder %s575_s8, %s900_s27  ;;  %s1005_s28 = smov [#allocation7]  }
 0x2e7   : > { %s567_s10 = sadd.s32 %s566_s9, %s565_s7  ;;  %s904_s0 = sshll.u32 %s1005_s28, 4  ;;  %s905_s0 = int_to_ptr.vmem [resolvable:$false] %s904_s0 }
 0x2e8   : > { %s692_s21 = sshll.u32 %s567_s10, 7  ;;  %p902_p4 = pnand %p901_p3, %p1083_p5 }
 0x2e9   : > { %s572_s20 = scalar_lea.hbm %s1235_s3, %s692_s21  ;;  %s906_s5 = scalar_lea.vmem %s905_s0, 256 }
 0x2ea   : > { %p903_p6 = pneg %p902_p4  ;;  %p907_p8 = scmp.lt.s32.totalorder %s575_s8, %s905_s0 }
 0x2eb   : > { %p908_p9 = scmp.lt.s32.totalorder %s906_s5, %s900_s27 }
 0x2ed   : > { %p909_p11 = por %p908_p9, %p907_p8 }
 0x2ef   : > { %p910_p13 = pnand %p909_p11, %p903_p6 }
 0x2f1   : > { %913 = shalt.err (!%p910_p13)
}
 0x2f2   : > { %s914_s15 = scalar_lea.hbm %s572_s20, 128  ;;  %s918_s30 = scalar_lea.hbm %s1235_s3, 512 }
 0x2f3   : > { %p915_p10 = scmp.ne.s32.totalorder %s572_s20, %s914_s15  ;;  %p919_p1 = scmp.lt.s32.totalorder %s572_s20, %s1235_s3 }
 0x2f4   : > { %p920_p2 = scmp.lt.s32.totalorder %s918_s30, %s914_s15 }
 0x2f5   : > { %p916_p12 = pnand %p915_p10, %p1083_p5 }
 0x2f6   : > { %p921_p3 = por %p920_p2, %p919_p1 }
 0x2f7   : > { %p917_p0 = pneg %p916_p12 }
 0x2f9   : > { %p922_p4 = pnand %p921_p3, %p917_p0 }
 0x2fb   : > { %925 = shalt.err (!%p922_p4)
}
 0x2fc   : > { %765 = dma.vmem_to_hbm [thread:$0]  (%p1083_p5), %s575_s8, 128, %s572_s20, %s557_s26  }
 0x2fd PF: > { %p777_p6 = scmp.ge.s32.totalorder %s996_s19, 2  ;;  %s586_s0 = sand.u32 1, %s968_s12  }
 0x2fe   : > { %s587_s10 = scalar_lea.sflag [#allocation6], %s586_s0 }
 0x2ff   : > { %p772_p8 = pnand %p777_p6, %p1090_p7 }
 0x301   : > { %p773_p9 = pneg %p772_p8 }
 0x303   : > { %963 = dma.done.wait (%p773_p9), %s587_s10, 128  }
 0x304   : > { %965 = vsyncadd (%p773_p9), %s587_s10, 4294967168  ;;  %s17_s19 = sadd.s32 1, %s996_s19   ;;  %s1244_s12 = smov %s972_s13 }
 0x305   : > { %p14_p11 = scmp.ge.s32.totalorder %s17_s19, 8   ;;  %s1245_s13 = smov %s976_s14 }
 0x306   : > { %s1246_s14 = smov %s1107_s11  ;;  %s1247_s15 = smov %s988_s17 }
 0x307   : > { %s1248_s16 = smov %s992_s18  ;;  %s1249_s17 = smov %s1252_s22 }
 0x308   : > { %s1250_s18 = smov %s1256_s23  ;;  %16 = sbr.rel (!%p14_p11) target bundleno = 8 (0x8), region = 84 }
 0x30d   :  { %592 = vsyncpa [#allocation5], 1 }
 0x30e   :  { %594 = vsyncpa [#allocation5 + $0x1], 1 }
 0x30f   :  { %595 = vsyncpa [#allocation6], 1 }
 0x310   :  { %597 = vsyncpa [#allocation6 + $0x1], 1 }

</bundles_post_ra>
